<compile_context>
chip_gen: v6e
topology: v6e:2x2x1
jax: 0.10.0
libtpu: 0.0.40
codegen_flags: <defaults>
</compile_context>

<pallas_src>
import functools

import jax
import jax.numpy as jnp
from jax.experimental import pallas as pl
from jax.experimental.pallas import tpu as pltpu


def _round_up(v, m):
    return pl.cdiv(v, m) * m


def make_graph_trojan_kernel(n_hidden, nfeat_out_pad):
    """Fused kernel: hidden MLP stack + single combined (feat|edge) head."""

    def kernel(thrd_ref, x_ref, *refs):
        # refs layout: n_hidden * (W_h, b_h), W_head, b_head, out
        n_in = 2 * n_hidden + 2
        w_refs = refs[:n_in]
        out_ref = refs[n_in]

        h = x_ref[...].astype(jnp.float32)

        # Hidden stack: Linear(nfeat, nfeat) + ReLU, repeated (layernum - 1) times.
        for l in range(n_hidden):
            w = w_refs[2 * l][...]
            b = w_refs[2 * l + 1][...]
            h = jnp.maximum(
                jnp.dot(h, w, preferred_element_type=jnp.float32) + b, 0.0
            )

        # Fused head: one lane-dense matmul producing [feat | edge(padded)].
        wh = w_refs[2 * n_hidden][...]
        bh = w_refs[2 * n_hidden + 1][...]
        head = jnp.dot(h, wh, preferred_element_type=jnp.float32) + bh

        # GradWhere forward applied only to the edge lanes (lane >= nfeat_out_pad).
        thrd = thrd_ref[0]
        lane = jax.lax.broadcasted_iota(jnp.int32, head.shape, dimension=1)
        is_edge_lane = lane >= nfeat_out_pad
        binarized = jnp.where(head > thrd, 1.0, 0.0)
        out_ref[...] = jnp.where(is_edge_lane, binarized, head).astype(out_ref.dtype)

    return kernel


def graph_trojan_forward(x, thrd, hidden_params, feat_w, feat_b, edge_w, edge_b,
                         *, row_block=128):
    """x: [N, nfeat] float32. thrd: [1] float32 (lives in SMEM).
    hidden_params: list of (W [nfeat,nfeat], b [1,nfeat]).
    feat_w: [nfeat, nout*nfeat], edge_w: [nfeat, nout*(nout-1)//2]."""
    N, nfeat = x.shape
    nfeat_out = feat_w.shape[1]
    nedge = edge_w.shape[1]
    n_hidden = len(hidden_params)

    # --- Fuse the two heads into one lane-dense weight/bias/output slab. ---
    nfeat_out_pad = _round_up(nfeat_out, 128)
    nedge_pad = _round_up(nedge, 128)
    ncomb = nfeat_out_pad + nedge_pad

    head_w = jnp.zeros((nfeat, ncomb), jnp.float32)
    head_w = head_w.at[:, :nfeat_out].set(feat_w)
    head_w = head_w.at[:, nfeat_out_pad:nfeat_out_pad + nedge].set(edge_w)
    head_b = jnp.zeros((1, ncomb), jnp.float32)
    head_b = head_b.at[:, :nfeat_out].set(feat_b)
    head_b = head_b.at[:, nfeat_out_pad:nfeat_out_pad + nedge].set(edge_b)

    # --- Pad rows so any N works with a large row tile. ---
    n_pad = _round_up(N, row_block)
    x_p = jnp.pad(x, ((0, n_pad - N), (0, 0))) if n_pad != N else x
    grid = (n_pad // row_block,)

    # Grid-invariant operands: single-buffered (no 2x VMEM for constants).
    def weight_spec(shape):
        return pl.BlockSpec(shape, lambda i: (0, 0), pipeline_mode=pl.Buffered(1))

    in_specs = [
        pl.BlockSpec(memory_space=pltpu.SMEM),                 # thrd scalar
        pl.BlockSpec((row_block, nfeat), lambda i: (i, 0)),    # x row tile
    ]
    args = [thrd, x_p]
    for (w, b) in hidden_params:
        in_specs.append(weight_spec((nfeat, nfeat)))
        in_specs.append(weight_spec((1, nfeat)))
        args += [w, b]
    in_specs.append(weight_spec((nfeat, ncomb)))
    in_specs.append(weight_spec((1, ncomb)))
    args += [head_w, head_b]

    out_specs = pl.BlockSpec((row_block, ncomb), lambda i: (i, 0))
    out_shape = jax.ShapeDtypeStruct((n_pad, ncomb), jnp.float32)

    # Scheduling hint + explicit VMEM budget.
    weight_bytes = 4 * (sum(w.size + b.size for (w, b) in hidden_params)
                        + head_w.size + head_b.size)
    flops = 2 * n_pad * nfeat * (n_hidden * nfeat + ncomb)
    bytes_accessed = 4 * (x_p.size + n_pad * ncomb) + weight_bytes
    cost = pl.CostEstimate(flops=flops, transcendentals=0,
                           bytes_accessed=bytes_accessed)

    per_step_io = 4 * row_block * (nfeat + ncomb)
    vmem_need = weight_bytes + 2 * per_step_io          # weights + 2x-buffered io tiles
    vmem_limit = int(min(max(2 * vmem_need, 16 * 1024 * 1024), 64 * 1024 * 1024))

    out = pl.pallas_call(
        make_graph_trojan_kernel(n_hidden, nfeat_out_pad),
        grid=grid,
        in_specs=in_specs,
        out_specs=out_specs,
        out_shape=out_shape,
        compiler_params=pltpu.CompilerParams(
            dimension_semantics=("parallel",),
            vmem_limit_bytes=vmem_limit,
        ),
        cost_estimate=cost,
    )(*args)

    feat = out[:N, :nfeat_out]
    edge = out[:N, nfeat_out_pad:nfeat_out_pad + nedge]
    return feat, edge


def init_linear(key, fan_in, fan_out):
    """nn.Linear-style init U(-1/sqrt(fan_in), +1/sqrt(fan_in)).
    W returned pre-transposed as [fan_in, fan_out]; b as [1, fan_out]."""
    k = 1.0 / jnp.sqrt(jnp.float32(fan_in))
    kw, kb = jax.random.split(key)
    w = jax.random.uniform(kw, (fan_in, fan_out), jnp.float32, -k, k)
    b = jax.random.uniform(kb, (1, fan_out), jnp.float32, -k, k)
    return w, b


def reference_forward(x, thrd, hidden_params, feat_w, feat_b, edge_w, edge_b):
    h = x
    for (w, b) in hidden_params:
        h = jnp.maximum(h @ w + b, 0.0)
    feat = h @ feat_w + feat_b
    edge_logits = h @ edge_w + edge_b
    edge = jnp.where(edge_logits > thrd, 1.0, 0.0)
    return feat, edge, edge_logits


if __name__ == "__main__":
    # Module config: dropout=0.0 -> no dropout layers; layernum=2 -> one hidden Linear+ReLU.
    N, nfeat, nout, layernum = 200, 32, 4, 2   # N not a multiple of 128 -> exercises padding
    nfeat_out = nout * nfeat
    nedge = nout * (nout - 1) // 2

    key = jax.random.PRNGKey(0)
    keys = jax.random.split(key, layernum + 3)

    hidden_params = [init_linear(keys[l], nfeat, nfeat) for l in range(layernum - 1)]
    feat_w, feat_b = init_linear(keys[layernum - 1], nfeat, nfeat_out)
    edge_w, edge_b = init_linear(keys[layernum], nfeat, nedge)

    x = jax.random.normal(keys[layernum + 1], (N, nfeat), jnp.float32)
    thrd = jnp.array([0.0], dtype=jnp.float32)

    feat, edge = graph_trojan_forward(
        x, thrd, hidden_params, feat_w, feat_b, edge_w, edge_b, row_block=128
    )
    feat, edge = jax.block_until_ready((feat, edge))

    # Correctness check against a pure-JAX reference.
    feat_ref, edge_ref, edge_logits = reference_forward(
        x, thrd[0], hidden_params, feat_w, feat_b, edge_w, edge_b
    )
    assert feat.shape == (N, nfeat_out) and edge.shape == (N, nedge)
    assert jnp.allclose(feat, feat_ref, atol=1e-5, rtol=1e-5)
    # Hard threshold: only tolerate disagreement for logits within fp noise of thrd.
    disagree = edge != edge_ref
    assert bool(jnp.all(jnp.where(disagree,
                                  jnp.abs(edge_logits - thrd[0]) < 1e-4,
                                  True)))

    print("KERNEL_OK")
</pallas_src>

<mosaic_0001>
module attributes {stable_mosaic.version = 11 : i64} {
  func.func @kernel(%arg0: i32, %arg1: memref<1xf32, #tpu.memory_space<smem>>, %arg2: memref<128x32xf32, #tpu.memory_space<vmem>>, %arg3: memref<32x32xf32, #tpu.memory_space<vmem>>, %arg4: memref<1x32xf32, #tpu.memory_space<vmem>>, %arg5: memref<32x256xf32, #tpu.memory_space<vmem>>, %arg6: memref<1x256xf32, #tpu.memory_space<vmem>>, %arg7: memref<128x256xf32, #tpu.memory_space<vmem>>) attributes {dimension_semantics = [#tpu.dimension_semantics<parallel>], iteration_bounds = array<i64: 2>, scalar_prefetch = 0 : i64, scratch_operands = 0 : i64, tpu.core_type = #tpu.core_type<tc>, window_params = [{transform_indices = @transform_0, window_bounds = array<i64: 1>}, {transform_indices = @transform_1, window_bounds = array<i64: 128, 32>}, {pipeline_mode = #tpu.pipeline_mode<synchronous>, transform_indices = @transform_2, window_bounds = array<i64: 32, 32>}, {pipeline_mode = #tpu.pipeline_mode<synchronous>, transform_indices = @transform_3, window_bounds = array<i64: 1, 32>}, {pipeline_mode = #tpu.pipeline_mode<synchronous>, transform_indices = @transform_4, window_bounds = array<i64: 32, 256>}, {pipeline_mode = #tpu.pipeline_mode<synchronous>, transform_indices = @transform_5, window_bounds = array<i64: 1, 256>}, {transform_indices = @transform_6, window_bounds = array<i64: 128, 256>}]} {
    %c0 = arith.constant 0 : index
    %c0_0 = arith.constant 0 : index
    %0 = vector.load %arg2[%c0, %c0_0] : memref<128x32xf32, #tpu.memory_space<vmem>>, vector<128x32xf32>
    %c0_1 = arith.constant 0 : index
    %c0_2 = arith.constant 0 : index
    %1 = vector.load %arg3[%c0_1, %c0_2] : memref<32x32xf32, #tpu.memory_space<vmem>>, vector<32x32xf32>
    %c0_3 = arith.constant 0 : index
    %c0_4 = arith.constant 0 : index
    %2 = vector.load %arg4[%c0_3, %c0_4] : memref<1x32xf32, #tpu.memory_space<vmem>>, vector<1x32xf32>
    %cst = arith.constant dense<0.000000e+00> : vector<128x32xf32>
    %3 = tpu.matmul %0, %1, %cst {dimension_numbers = #tpu.dot_dimension_numbers<[1], [0], [0], [1], [0, 0, 1, 1], [], []>} : vector<128x32xf32>, vector<32x32xf32>, vector<128x32xf32> -> vector<128x32xf32>
    %4 = vector.broadcast %2 : vector<1x32xf32> to vector<128x32xf32>
    %5 = arith.addf %3, %4 : vector<128x32xf32>
    %cst_5 = arith.constant 0.000000e+00 : f32
    %6 = vector.broadcast %cst_5 : f32 to vector<128x32xf32>
    %7 = arith.maximumf %5, %6 : vector<128x32xf32>
    %c0_6 = arith.constant 0 : index
    %c0_7 = arith.constant 0 : index
    %8 = vector.load %arg5[%c0_6, %c0_7] : memref<32x256xf32, #tpu.memory_space<vmem>>, vector<32x256xf32>
    %c0_8 = arith.constant 0 : index
    %c0_9 = arith.constant 0 : index
    %9 = vector.load %arg6[%c0_8, %c0_9] : memref<1x256xf32, #tpu.memory_space<vmem>>, vector<1x256xf32>
    %cst_10 = arith.constant dense<0.000000e+00> : vector<128x256xf32>
    %10 = tpu.matmul %7, %8, %cst_10 {dimension_numbers = #tpu.dot_dimension_numbers<[1], [0], [0], [1], [0, 0, 1, 1], [], []>} : vector<128x32xf32>, vector<32x256xf32>, vector<128x256xf32> -> vector<128x256xf32>
    %11 = vector.broadcast %9 : vector<1x256xf32> to vector<128x256xf32>
    %12 = arith.addf %10, %11 : vector<128x256xf32>
    %c0_11 = arith.constant 0 : index
    %13 = memref.load %arg1[%c0_11] : memref<1xf32, #tpu.memory_space<smem>>
    %14 = tpu.iota {dimensions = array<i32: 1>} : vector<128x256xi32>
    %c128_i32 = arith.constant 128 : i32
    %15 = vector.broadcast %c128_i32 : i32 to vector<128x256xi32>
    %16 = arith.cmpi sge, %14, %15 : vector<128x256xi32>
    %17 = vector.broadcast %13 : f32 to vector<128x256xf32>
    %18 = arith.cmpf ogt, %12, %17 : vector<128x256xf32>
    %cst_12 = arith.constant 1.000000e+00 : f32
    %cst_13 = arith.constant 0.000000e+00 : f32
    %19 = vector.broadcast %cst_12 : f32 to vector<128x256xf32>
    %20 = vector.broadcast %cst_13 : f32 to vector<128x256xf32>
    %21 = arith.select %18, %19, %20 : vector<128x256xi1>, vector<128x256xf32>
    %22 = arith.select %16, %21, %12 : vector<128x256xi1>, vector<128x256xf32>
    %c0_14 = arith.constant 0 : index
    %c0_15 = arith.constant 0 : index
    %23 = vector.load %arg7[%c0_14, %c0_15] : memref<128x256xf32, #tpu.memory_space<vmem>>, vector<128x256xf32>
    tpu.vector_store %arg7[%c0_14, %c0_15], %22 {strides = array<i32>} : memref<128x256xf32, #tpu.memory_space<vmem>>, vector<128x256xf32>,
    return
  }
  func.func @transform_0(%arg0: i32) -> i32 {
    %c0_i32 = arith.constant 0 : i32
    %c0_i32_0 = arith.constant 0 : i32
    return %c0_i32 : i32
  }
  func.func @transform_1(%arg0: i32) -> (i32, i32) {
    %c0_i32 = arith.constant 0 : i32
    %c0_i32_0 = arith.constant 0 : i32
    return %arg0, %c0_i32 : i32, i32
  }
  func.func @transform_2(%arg0: i32) -> (i32, i32) {
    %c0_i32 = arith.constant 0 : i32
    %c0_i32_0 = arith.constant 0 : i32
    %c0_i32_1 = arith.constant 0 : i32
    return %c0_i32, %c0_i32_0 : i32, i32
  }
  func.func @transform_3(%arg0: i32) -> (i32, i32) {
    %c0_i32 = arith.constant 0 : i32
    %c0_i32_0 = arith.constant 0 : i32
    %c0_i32_1 = arith.constant 0 : i32
    return %c0_i32, %c0_i32_0 : i32, i32
  }
  func.func @transform_4(%arg0: i32) -> (i32, i32) {
    %c0_i32 = arith.constant 0 : i32
    %c0_i32_0 = arith.constant 0 : i32
    %c0_i32_1 = arith.constant 0 : i32
    return %c0_i32, %c0_i32_0 : i32, i32
  }
  func.func @transform_5(%arg0: i32) -> (i32, i32) {
    %c0_i32 = arith.constant 0 : i32
    %c0_i32_0 = arith.constant 0 : i32
    %c0_i32_1 = arith.constant 0 : i32
    return %c0_i32, %c0_i32_0 : i32, i32
  }
  func.func @transform_6(%arg0: i32) -> (i32, i32) {
    %c0_i32 = arith.constant 0 : i32
    %c0_i32_0 = arith.constant 0 : i32
    return %arg0, %c0_i32 : i32, i32
  }
}

</mosaic_0001>

<bundles_post_ra>
// kernel: tpu_custom_call.1
= control target key start
LH: loop header
LB: loop body
LE: loop exit
PB: predicated region body
PF: predicated region fallthrough
CT: control target
= control target key end

     0   :  { %s1522_s0 = inlined_call_operand.<no memory space> [shape: f32[1], index: 0, kind: input, shape index: {}]   ;;  %s1523_s1 = inlined_call_operand.vmem [shape: f32[256,32], index: 1, kind: input, shape index: {}]   ;;  %s1524_s2 = inlined_call_operand.vmem [shape: f32[32,32], index: 2, kind: input, shape index: {}]   ;;  %s1525_s3 = inlined_call_operand.vmem [shape: f32[1,32], index: 3, kind: input, shape index: {}]   ;;  %s1526_s4 = inlined_call_operand.vmem [shape: f32[32,256], index: 4, kind: input, shape index: {}]   ;;  %s1527_s5 = inlined_call_operand.vmem [shape: f32[1,256], index: 5, kind: input, shape index: {}]   ;;  %s1528_s6 = inlined_call_operand.hbm [shape: f32[256,256], index: 6, kind: output, shape index: {}]  }
   0x1   :  { %11 = sst [smem:[#allocation2]] %s1522_s0 }
   0x2   :  { %12 = vsyncpa [#allocation4], 0 }
   0x3   :  { %14 = vsyncpa [#allocation4 + $0x1], 0  ;;  %s1186_s23 = smov 0   ;;  %s1188_s24 = smov 0  }
   0x4   :  { %s1190_s25 = smov 0   ;;  %s1192_s26 = smov 0  }
   0x5 LB: > { %s1207_s0 = sadd.s32 4294967295, %s1142_s26   ;;  %s932_s27 = sadd.s32 4294967294, %s1142_s26   ;;  %s1142_s26 = sphi %s1192_s26, %s1534_s26   ;;  %s1138_s25 = sphi %s1190_s25, %s1533_s25   ;;  %s1134_s24 = sphi %s1188_s24, %s1532_s24   ;;  %s1130_s23 = sphi %s1186_s23, %s1531_s23  }
   0x6   : > { %s1211_s28 = sadd.s32 1, %s1142_s26   ;;  %s158_s29 = sadd.s32 1, %s1138_s25 }
   0x7   : > { %s155_s30 = ssub.s32 %s1142_s26, %s1211_s28  ;;  %p168_p0 = scmp.ne.s32.totalorder %s1138_s25, %s1134_s24 }
   0x8   : > { %p156_p1 = scmp.eq.s32.totalorder %s155_s30, 0  ;;  %p169_p2 = scmp.eq.s32.totalorder %s1207_s0, 1 }
   0x9   : > { %p174_p3 = scmp.ne.s32.totalorder %s1134_s24, %s1130_s23  ;;  %p175_p4 = scmp.eq.s32.totalorder %s932_s27, 1 }
   0xa   : > { %s1222_s7 = scalar_select %p156_p1, %s1138_s25, %s158_s29  }
   0xb   : > { %p1224_p5 = por %p169_p2, %p168_p0  ;;  %p1228_p6 = por %p175_p4, %p174_p3 }
   0xc   : > { %p935_p7 = scmp.ge.s32.totalorder %s1142_s26, 1  ;;  %p217_p8 = scmp.lt.s32.totalorder %s1142_s26, 3 }
   0xe   : > { %p218_p9 = pnand %p935_p7, %p217_p8 }
   0xf   : > { %s937_s14 = sshll.u32 (!%p218_p9), %s1207_s0, 4  ;;  %s244_s30 = sand.u32 (!%p218_p9), 1, %s1134_s24  }
  0x10   : > { %221 = sbr.rel (%p218_p9) target bundleno = 494 (0x1ee), region = 44  ;;  %p248_p10 = scmp.lt.s32.totalorder (!%p218_p9), %s937_s14, 31 }
  0x11   : > { %s720_s12 = sld [smem:[#allocation2]] (!%p218_p9)  ;;  %s936_s13 = sshll.u32 (!%p218_p9), %s244_s30, 8 }
  0x12   : > { %s979_s15 = sshll.u32 (!%p218_p9), %s1207_s0, 12  ;;  %s1482_s0 = scalar_lea.sflag (!%p218_p9), [#allocation4], %s244_s30 }
  0x13   : > { %s1473_s19 = scalar_lea.hbm (!%p218_p9), %s1528_s6, %s979_s15 }
  0x15   : > { %v273_v0 = vld [vmem:[%s1524_s2 + $0x18] sm:$0xff]  ;;  %v272_v1 = vld [vmem:[%s1524_s2 + $0x10] sm:$0xff]  ;;  %v271_v3 = vld [vmem:[%s1524_s2 + $0x8] sm:$0xff]  ;;  %s1536_s14 = smov (!%p248_p10, %s937_s14), 31  ;;  %vm281_vm0 = vcmask 261120   ;;  %v1144_v28 = vmov 0.0  }
  0x16   : > { %1000 = vmatprep.subr.mxu0 %v273_v0  ;;  %v498_v2 = vld [vmem:[%s1526_s4 + $0x38] sm:$0xff]  ;;  %v270_v4 = vld [vmem:[%s1524_s2] sm:$0xff]  ;;  %s938_s21 = sshll.u32 %s1536_s14, 3  ;;  %v497_v21 = vld [vmem:[%s1526_s4 + $0x30] sm:$0xff]  ;;  %647 = vmatprep.mubr.f32.mxu1 %v1144_v28  ;;  %s1374_s14 = scalar_lea.vmem [#allocation3], %s936_s13 }
  0x17   : > { %1001 = vmatpush3.msra.mxu0 %v273_v0  ;;  %1032 = vmatprep.subr.mxu1 %v498_v2  ;;  %s1253_s29 = scalar_lea.vmem %s1523_s1, %s938_s21  ;;  %v496_v22 = vld [vmem:[%s1526_s4 + $0x28] sm:$0xff]  ;;  %v495_v23 = vld [vmem:[%s1526_s4 + $0x20] sm:$0xff]  ;;  %v494_v24 = vld [vmem:[%s1526_s4 + $0x18] sm:$0xff]  ;;  %s870_s16 = sshll.u32 %s1374_s14, 4  ;;  %s1475_s16 = int_to_ptr.vmem [resolvable:$true] %s870_s16 }
  0x18   : > { %1002 = vmatprep.subr.mxu0 %v272_v1  ;;  %v254_v5 = vld [vmem:[%s1253_s29] sm:$0xff]  ;;  %v255_v6 = vld [vmem:[%s1253_s29 + $0x8] sm:$0xff]  ;;  %v256_v7 = vld [vmem:[%s1253_s29 + $0x10] sm:$0xff]  ;;  %1036 = vmatpush1.msra.mxu1 %v497_v21  ;;  %s1082_s20 = scalar_lea.vmem %s1475_s16, 4096  ;;  %s1145_s21 = smov [#allocation3]  }
  0x19   : > { %1003 = vmatpush3.msra.mxu0 %v272_v1  ;;  %1008 = vmatprep.mubr.msk.f32.mxu0 %vm281_vm0, %v254_v5  ;;  %v257_v8 = vld [vmem:[%s1253_s29 + $0x18] sm:$0xff]  ;;  %v258_v9 = vld [vmem:[%s1253_s29 + $0x20] sm:$0xff]  ;;  %v259_v10 = vld [vmem:[%s1253_s29 + $0x28] sm:$0xff]  ;;  %p1083_p11 = scmp.ne.s32.totalorder %s1475_s16, %s1082_s20  ;;  %s1086_s22 = sshll.u32 %s1145_s21, 4  ;;  %s1087_s22 = int_to_ptr.vmem [resolvable:$false] %s1086_s22 }
  0x1a   : > { %1004 = vmatprep.subr.mxu0 %v271_v3  ;;  %v260_v11 = vld [vmem:[%s1253_s29 + $0x30] sm:$0xff]  ;;  %v261_v12 = vld [vmem:[%s1253_s29 + $0x38] sm:$0xff]  ;;  %v262_v13 = vld [vmem:[%s1253_s29 + $0x40] sm:$0xff]  ;;  %1033 = vmatprep.subr.mxu1 %v496_v22  ;;  %s1088_s27 = scalar_lea.vmem %s1087_s22, 8192  ;;  %p1089_p0 = scmp.lt.s32.totalorder %s1475_s16, %s1087_s22 }
  0x1b   : > { %1005 = vmatpush3.msra.mxu0 %v271_v3  ;;  %v263_v14 = vld [vmem:[%s1253_s29 + $0x48] sm:$0xff]  ;;  %v264_v15 = vld [vmem:[%s1253_s29 + $0x50] sm:$0xff]  ;;  %v265_v16 = vld [vmem:[%s1253_s29 + $0x58] sm:$0xff]  ;;  %1037 = vmatpush1.msra.mxu1 %v495_v23  ;;  %p1084_p12 = pnand %p1083_p11, %p1224_p5  ;;  %p1090_p1 = scmp.lt.s32.totalorder %s1088_s27, %s1082_s20 }
  0x1c   : > { %1006 = vmatprep.subr.mxu0 %v270_v4  ;;  %v266_v17 = vld [vmem:[%s1253_s29 + $0x60] sm:$0xff]  ;;  %v267_v18 = vld [vmem:[%s1253_s29 + $0x68] sm:$0xff]  ;;  %v268_v19 = vld [vmem:[%s1253_s29 + $0x70] sm:$0xff]  ;;  %1034 = vmatprep.subr.mxu1 %v494_v24 }
  0x1d   : > { %1007 = vmatpush3.msra.mxu0 %v270_v4  ;;  %v269_v20 = vld [vmem:[%s1253_s29 + $0x78] sm:$0xff]  ;;  %v493_v25 = vld [vmem:[%s1526_s4 + $0x10] sm:$0xff]  ;;  %v492_v26 = vld [vmem:[%s1526_s4 + $0x8] sm:$0xff]  ;;  %p1085_p13 = pneg %p1084_p12  ;;  %p1091_p2 = por %p1090_p1, %p1089_p0 }
  0x1e   : > { %1009 = vmatmul.mubr.msk.f32.vlgmr.msra.gmra.mxu0 %vm281_vm0, %v255_v6  ;;  %583 = vmatprep.subr.mxu0 %v498_v2  ;;  %v491_v27 = vld [vmem:[%s1526_s4] sm:$0xff] }
  0x1f   : > { %1011 = vmatprep.mubr.msk.f32.mxu0 %vm281_vm0, %v256_v7  ;;  %584 = vmatpush1.msra.mxu0 %v497_v21  ;;  %v1313_v30 = vld [vmem:[%s1525_s3] ss:$0 sm:$0xff]  ;;  %p1092_p3 = pnand %p1091_p2, %p1085_p13 }
  0x20   : > { %585 = vmatprep.subr.mxu0 %v496_v22  ;;  %1038 = vmatpush1.msra.mxu1 %v493_v25 }
  0x21   : > { %586 = vmatpush1.msra.mxu0 %v495_v23  ;;  %1035 = vmatprep.subr.mxu1 %v492_v26 }
  0x22   : > { %1012 = vmatmul.mubr.msk.f32.gmra.mxu0 %vm281_vm0, %v257_v8  ;;  %587 = vmatprep.subr.mxu0 %v494_v24  ;;  %v1372_v24 = vstv %s720_s12 }
  0x23   : > { %1014 = vmatprep.mubr.msk.f32.mxu0 %vm281_vm0, %v258_v9  ;;  %588 = vmatpush1.msra.mxu0 %v493_v25 }
  0x24   : > { %589 = vmatprep.subr.mxu0 %v492_v26  ;;  %1039 = vmatpush1.msra.mxu1 %v491_v27 }
  0x25   : > { %590 = vmatpush1.msra.mxu0 %v491_v27 }
  0x26   : > { %1015 = vmatmul.mubr.msk.f32.gmra.mxu0 %vm281_vm0, %v259_v10 }
  0x27   : > { %1017 = vmatprep.mubr.msk.f32.mxu0 %vm281_vm0, %v260_v11 }
  0x2a   : > { %1018 = vmatmul.mubr.msk.f32.gmra.mxu0 %vm281_vm0, %v261_v12 }
  0x2b   : > { %1020 = vmatprep.mubr.msk.f32.mxu0 %vm281_vm0, %v262_v13 }
  0x2e   : > { %1021 = vmatmul.mubr.msk.f32.gmra.mxu0 %vm281_vm0, %v263_v14  ;;  %v501_v14 = vlaneseq }
  0x2f   : > { %1023 = vmatprep.mubr.msk.f32.mxu0 %vm281_vm0, %v264_v15 }
  0x30   : > { %v502_v15 = vshrl.u32 %v501_v14, 7 }
  0x32   : > { %1024 = vmatmul.mubr.msk.f32.gmra.mxu0 %vm281_vm0, %v265_v16  ;;  %v503_v16 = vsub.s32 0, %v502_v15 }
  0x33   : > { %1026 = vmatprep.mubr.msk.f32.mxu0 %vm281_vm0, %v266_v17  ;;  %v499_v17 = vld [vmem:[%s1527_s5] sm:$0x3] }
  0x36   : > { %1027 = vmatmul.mubr.msk.f32.gmra.mxu0 %vm281_vm0, %v267_v18  ;;  %v507_v18 = vsub.s32 1, %v502_v15 }
  0x37   : > { %1029 = vmatprep.mubr.msk.f32.mxu0 %vm281_vm0, %v268_v19  ;;  %v1367_v19 = vrot.slane %v499_v17, %v503_v16 }
  0x3a   : > { %1030 = vmatmul.mubr.msk.f32.gmra.mxu0 %vm281_vm0, %v269_v20  ;;  %v1369_v20 = vrot.slane %v499_v17, %v507_v18 }
  0x3b   : > { %623 = vmatprep.mubr.f32.mxu0 %v1144_v28 }
  0xde   : > { %v1010_v29 = vpop.f32.mrf.mxu0 }
  0xdf   : > { %v402_v34 = vadd.f32 %v1010_v29, %v1313_v30 }
  0xe0   : > { %v396_v31 = vpop.f32.mrf.mxu0 }
  0xe1   : > { %v397_v32 = vadd.f32 %v1313_v30, %v396_v31  ;;  %v476_v38 = vmax.f32 %v402_v34, 0.0 }
  0xe2   : > { %v1013_v33 = vpop.f32.mrf.mxu0 }
  0xe3   : > { %v475_v35 = vmax.f32 %v397_v32, 0.0  ;;  %v412_v43 = vadd.f32 %v1013_v33, %v1313_v30 }
  0xe4   : > { %v406_v36 = vpop.f32.mrf.mxu0 }
  0xe5   : > { %956 = vmatmul.mubr.msk.f32.vlgmr.msra.gmra.mxu0 %vm281_vm0, %v475_v35  ;;  %v407_v39 = vadd.f32 %v1313_v30, %v406_v36  ;;  %v478_v48 = vmax.f32 %v412_v43, 0.0 }
  0xe6   : > { %v1016_v37 = vpop.f32.mrf.mxu0  ;;  %629 = vmatprep.mubr.f32.mxu0 %v1144_v28 }
  0xe7   : > { %v477_v44 = vmax.f32 %v407_v39, 0.0  ;;  %v422_v45 = vadd.f32 %v1016_v37, %v1313_v30 }
  0xe8   : > { %v416_v40 = vpop.f32.mrf.mxu0 }
  0xe9   : > { %v417_v41 = vadd.f32 %v1313_v30, %v416_v40  ;;  %957 = vmatmul.mubr.msk.f32.gmra.mxu0 %vm281_vm0, %v476_v38  ;;  %v480_v49 = vmax.f32 %v422_v45, 0.0 }
  0xea   : > { %v1019_v42 = vpop.f32.mrf.mxu0  ;;  %635 = vmatprep.mubr.f32.mxu0 %v1144_v28 }
  0xeb   : > { %v479_v46 = vmax.f32 %v417_v41, 0.0  ;;  %v432_v52 = vadd.f32 %v1019_v42, %v1313_v30 }
  0xec   : > { %v426_v47 = vpop.f32.mrf.mxu0 }
  0xed   : > { %958 = vmatmul.mubr.msk.f32.gmra.mxu0 %vm281_vm0, %v477_v44  ;;  %960 = vmatmul.mubr.msk.f32.vlgmr.msra.gmra.mxu1 %vm281_vm0, %v479_v46  ;;  %v427_v50 = vadd.f32 %v1313_v30, %v426_v47  ;;  %v482_v55 = vmax.f32 %v432_v52, 0.0 }
  0xee   : > { %641 = vmatprep.mubr.f32.mxu0 %v1144_v28  ;;  %653 = vmatprep.mubr.f32.mxu1 %v1144_v28  ;;  %v1022_v51 = vpop.f32.mrf.mxu0 }
  0xef   : > { %v481_v53 = vmax.f32 %v427_v50, 0.0  ;;  %v442_v58 = vadd.f32 %v1022_v51, %v1313_v30 }
  0xf0   : > { %v436_v54 = vpop.f32.mrf.mxu0 }
  0xf1   : > { %959 = vmatmul.mubr.msk.f32.gmra.mxu0 %vm281_vm0, %v478_v48  ;;  %961 = vmatmul.mubr.msk.f32.gmra.mxu1 %vm281_vm0, %v480_v49  ;;  %v437_v56 = vadd.f32 %v1313_v30, %v436_v54  ;;  %v484_v61 = vmax.f32 %v442_v58, 0.0 }
  0xf2   : > { %659 = vmatprep.mubr.f32.mxu1 %v1144_v28  ;;  %v1025_v57 = vpop.f32.mrf.mxu0 }
  0xf3   : > { %v483_v59 = vmax.f32 %v437_v56, 0.0  ;;  %v452_v0 = vadd.f32 %v1025_v57, %v1313_v30 }
  0xf4   : > { %v446_v60 = vpop.f32.mrf.mxu0 }
  0xf5   : > { %962 = vmatmul.mubr.msk.f32.gmra.mxu1 %vm281_vm0, %v481_v53  ;;  %v447_v62 = vadd.f32 %v1313_v30, %v446_v60  ;;  %v486_v3 = vmax.f32 %v452_v0, 0.0 }
  0xf6   : > { %665 = vmatprep.mubr.f32.mxu1 %v1144_v28  ;;  %v1028_v63 = vpop.f32.mrf.mxu0 }
  0xf7   : > { %v485_v1 = vmax.f32 %v447_v62, 0.0  ;;  %v462_v6 = vadd.f32 %v1028_v63, %v1313_v30 }
  0xf8   : > { %v456_v2 = vpop.f32.mrf.mxu0 }
  0xf9   : > { %963 = vmatmul.mubr.msk.f32.gmra.mxu1 %vm281_vm0, %v482_v55  ;;  %v457_v4 = vadd.f32 %v1313_v30, %v456_v2  ;;  %v488_v9 = vmax.f32 %v462_v6, 0.0 }
  0xfa   : > { %671 = vmatprep.mubr.f32.mxu1 %v1144_v28  ;;  %v1031_v5 = vpop.f32.mrf.mxu0 }
  0xfb   : > { %v487_v7 = vmax.f32 %v457_v4, 0.0  ;;  %v472_v11 = vadd.f32 %v1031_v5, %v1313_v30 }
  0xfc   : > { %v466_v8 = vpop.f32.mrf.mxu0 }
  0xfd   : > { %964 = vmatmul.mubr.msk.f32.gmra.mxu1 %vm281_vm0, %v483_v59  ;;  %v467_v10 = vadd.f32 %v1313_v30, %v466_v8  ;;  %v490_v13 = vmax.f32 %v472_v11, 0.0 }
  0xfe   : > { %677 = vmatprep.mubr.f32.mxu1 %v1144_v28 }
  0xff   : > { %v489_v12 = vmax.f32 %v467_v10, 0.0 }
 0x101   : > { %965 = vmatmul.mubr.msk.f32.gmra.mxu1 %vm281_vm0, %v484_v61 }
 0x102   : > { %683 = vmatprep.mubr.f32.mxu1 %v1144_v28 }
 0x105   : > { %966 = vmatmul.mubr.msk.f32.gmra.mxu1 %vm281_vm0, %v485_v1 }
 0x106   : > { %689 = vmatprep.mubr.f32.mxu1 %v1144_v28 }
 0x109   : > { %967 = vmatmul.mubr.msk.f32.gmra.mxu1 %vm281_vm0, %v486_v3 }
 0x10a   : > { %695 = vmatprep.mubr.f32.mxu1 %v1144_v28 }
 0x10d   : > { %968 = vmatmul.mubr.msk.f32.gmra.mxu1 %vm281_vm0, %v487_v7 }
 0x10e   : > { %701 = vmatprep.mubr.f32.mxu1 %v1144_v28 }
 0x111   : > { %969 = vmatmul.mubr.msk.f32.gmra.mxu1 %vm281_vm0, %v488_v9 }
 0x112   : > { %707 = vmatprep.mubr.f32.mxu1 %v1144_v28 }
 0x115   : > { %970 = vmatmul.mubr.msk.f32.gmra.mxu1 %vm281_vm0, %v489_v12 }
 0x116   : > { %713 = vmatprep.mubr.f32.mxu1 %v1144_v28 }
 0x119   : > { %971 = vmatmul.mubr.msk.f32.gmra.mxu1 %vm281_vm0, %v490_v13 }
 0x1a5   : > { %v625_v21 = vpop.f32.mrf.mxu0 }
 0x1a6   : > { %v626_v22 = vadd.f32 %v625_v21, %v1367_v19 }
 0x1a7   : > { %v627_v23 = vpop.f32.mrf.mxu0 }
 0x1a8   : > { %823 = vst [vmem:[%s1374_s14] sm:$0xff] %v626_v22  ;;  %v628_v25 = vadd.f32 %v627_v23, %v1369_v20 }
 0x1a9   : > { %v631_v26 = vpop.f32.mrf.mxu0 }
 0x1aa   : > { %vm728_vm1 = vcmp.gt.f32.partialorder %v628_v25, %v1372_v24  ;;  %v632_v27 = vadd.f32 %v631_v26, %v1367_v19 }
 0x1ab   : > { %v760_v29 = vsel %vm728_vm1, 1.0, %v1144_v28  ;;  %v633_v30 = vpop.f32.mrf.mxu0 }
 0x1ac   : > { %824 = vst [vmem:[%s1374_s14 + $0x8] sm:$0xff] %v760_v29  ;;  %825 = vst [vmem:[%s1374_s14 + $0x10] sm:$0xff] %v632_v27  ;;  %v634_v31 = vadd.f32 %v633_v30, %v1369_v20 }
 0x1ad   : > { %v637_v32 = vpop.f32.mrf.mxu0  ;;  %v649_v33 = vpop.f32.mrf.mxu1 }
 0x1ae   : > { %vm730_vm2 = vcmp.gt.f32.partialorder %v634_v31, %v1372_v24  ;;  %v638_v34 = vadd.f32 %v637_v32, %v1367_v19  ;;  %v650_v35 = vadd.f32 %v649_v33, %v1367_v19 }
 0x1af   : > { %v762_v36 = vsel %vm730_vm2, 1.0, %v1144_v28  ;;  %v639_v37 = vpop.f32.mrf.mxu0  ;;  %v651_v38 = vpop.f32.mrf.mxu1 }
 0x1b0   : > { %826 = vst [vmem:[%s1374_s14 + $0x18] sm:$0xff] %v762_v36  ;;  %827 = vst [vmem:[%s1374_s14 + $0x20] sm:$0xff] %v638_v34  ;;  %v640_v39 = vadd.f32 %v639_v37, %v1369_v20  ;;  %v652_v40 = vadd.f32 %v651_v38, %v1369_v20 }
 0x1b1   : > { %831 = vst [vmem:[%s1374_s14 + $0x40] sm:$0xff] %v650_v35  ;;  %v643_v41 = vpop.f32.mrf.mxu0  ;;  %v655_v42 = vpop.f32.mrf.mxu1 }
 0x1b2   : > { %vm732_vm3 = vcmp.gt.f32.partialorder %v640_v39, %v1372_v24  ;;  %vm736_vm4 = vcmp.gt.f32.partialorder %v652_v40, %v1372_v24  ;;  %v644_v43 = vadd.f32 %v643_v41, %v1367_v19  ;;  %v656_v44 = vadd.f32 %v655_v42, %v1367_v19 }
 0x1b3   : > { %v764_v45 = vsel %vm732_vm3, 1.0, %v1144_v28  ;;  %v768_v46 = vsel %vm736_vm4, 1.0, %v1144_v28  ;;  %v645_v47 = vpop.f32.mrf.mxu0  ;;  %v657_v48 = vpop.f32.mrf.mxu1 }
 0x1b4   : > { %828 = vst [vmem:[%s1374_s14 + $0x28] sm:$0xff] %v764_v45  ;;  %832 = vst [vmem:[%s1374_s14 + $0x48] sm:$0xff] %v768_v46  ;;  %v646_v49 = vadd.f32 %v645_v47, %v1369_v20  ;;  %v658_v50 = vadd.f32 %v657_v48, %v1369_v20 }
 0x1b5   : > { %829 = vst [vmem:[%s1374_s14 + $0x30] sm:$0xff] %v644_v43  ;;  %833 = vst [vmem:[%s1374_s14 + $0x50] sm:$0xff] %v656_v44  ;;  %v661_v51 = vpop.f32.mrf.mxu1 }
 0x1b6   : > { %vm734_vm5 = vcmp.gt.f32.partialorder %v646_v49, %v1372_v24  ;;  %vm738_vm6 = vcmp.gt.f32.partialorder %v658_v50, %v1372_v24  ;;  %v662_v52 = vadd.f32 %v661_v51, %v1367_v19 }
 0x1b7   : > { %v766_v53 = vsel %vm734_vm5, 1.0, %v1144_v28  ;;  %v770_v54 = vsel %vm738_vm6, 1.0, %v1144_v28  ;;  %v663_v55 = vpop.f32.mrf.mxu1 }
 0x1b8   : > { %830 = vst [vmem:[%s1374_s14 + $0x38] sm:$0xff] %v766_v53  ;;  %834 = vst [vmem:[%s1374_s14 + $0x58] sm:$0xff] %v770_v54  ;;  %v664_v56 = vadd.f32 %v663_v55, %v1369_v20 }
 0x1b9   : > { %835 = vst [vmem:[%s1374_s14 + $0x60] sm:$0xff] %v662_v52  ;;  %v667_v57 = vpop.f32.mrf.mxu1 }
 0x1ba   : > { %vm740_vm7 = vcmp.gt.f32.partialorder %v664_v56, %v1372_v24  ;;  %v668_v58 = vadd.f32 %v667_v57, %v1367_v19 }
 0x1bb   : > { %v772_v59 = vsel %vm740_vm7, 1.0, %v1144_v28  ;;  %v669_v60 = vpop.f32.mrf.mxu1 }
 0x1bc   : > { %836 = vst [vmem:[%s1374_s14 + $0x68] sm:$0xff] %v772_v59  ;;  %837 = vst [vmem:[%s1374_s14 + $0x70] sm:$0xff] %v668_v58  ;;  %v670_v61 = vadd.f32 %v669_v60, %v1369_v20 }
 0x1bd   : > { %v673_v62 = vpop.f32.mrf.mxu1 }
 0x1be   : > { %vm742_vm8 = vcmp.gt.f32.partialorder %v670_v61, %v1372_v24  ;;  %v674_v63 = vadd.f32 %v673_v62, %v1367_v19 }
 0x1bf   : > { %v774_v0 = vsel %vm742_vm8, 1.0, %v1144_v28  ;;  %v675_v1 = vpop.f32.mrf.mxu1 }
 0x1c0   : > { %838 = vst [vmem:[%s1374_s14 + $0x78] sm:$0xff] %v774_v0  ;;  %839 = vst [vmem:[%s1374_s14 + $0x80] sm:$0xff] %v674_v63  ;;  %v676_v2 = vadd.f32 %v675_v1, %v1369_v20 }
 0x1c1   : > { %v679_v3 = vpop.f32.mrf.mxu1 }
 0x1c2   : > { %vm744_vm9 = vcmp.gt.f32.partialorder %v676_v2, %v1372_v24  ;;  %v680_v4 = vadd.f32 %v679_v3, %v1367_v19 }
 0x1c3   : > { %v776_v5 = vsel %vm744_vm9, 1.0, %v1144_v28  ;;  %v681_v6 = vpop.f32.mrf.mxu1 }
 0x1c4   : > { %840 = vst [vmem:[%s1374_s14 + $0x88] sm:$0xff] %v776_v5  ;;  %841 = vst [vmem:[%s1374_s14 + $0x90] sm:$0xff] %v680_v4  ;;  %v682_v7 = vadd.f32 %v681_v6, %v1369_v20 }
 0x1c5   : > { %v685_v8 = vpop.f32.mrf.mxu1 }
 0x1c6   : > { %vm746_vm10 = vcmp.gt.f32.partialorder %v682_v7, %v1372_v24  ;;  %v686_v9 = vadd.f32 %v685_v8, %v1367_v19 }
 0x1c7   : > { %v778_v10 = vsel %vm746_vm10, 1.0, %v1144_v28  ;;  %v687_v11 = vpop.f32.mrf.mxu1 }
 0x1c8   : > { %842 = vst [vmem:[%s1374_s14 + $0x98] sm:$0xff] %v778_v10  ;;  %843 = vst [vmem:[%s1374_s14 + $0xa0] sm:$0xff] %v686_v9  ;;  %v688_v12 = vadd.f32 %v687_v11, %v1369_v20 }
 0x1c9   : > { %v691_v13 = vpop.f32.mrf.mxu1 }
 0x1ca   : > { %vm748_vm11 = vcmp.gt.f32.partialorder %v688_v12, %v1372_v24  ;;  %v692_v14 = vadd.f32 %v691_v13, %v1367_v19 }
 0x1cb   : > { %v780_v15 = vsel %vm748_vm11, 1.0, %v1144_v28  ;;  %v693_v16 = vpop.f32.mrf.mxu1 }
 0x1cc   : > { %844 = vst [vmem:[%s1374_s14 + $0xa8] sm:$0xff] %v780_v15  ;;  %845 = vst [vmem:[%s1374_s14 + $0xb0] sm:$0xff] %v692_v14  ;;  %v694_v17 = vadd.f32 %v693_v16, %v1369_v20 }
 0x1cd   : > { %v697_v18 = vpop.f32.mrf.mxu1 }
 0x1ce   : > { %vm750_vm12 = vcmp.gt.f32.partialorder %v694_v17, %v1372_v24  ;;  %v698_v21 = vadd.f32 %v697_v18, %v1367_v19 }
 0x1cf   : > { %v782_v22 = vsel %vm750_vm12, 1.0, %v1144_v28  ;;  %v699_v23 = vpop.f32.mrf.mxu1 }
 0x1d0   : > { %846 = vst [vmem:[%s1374_s14 + $0xb8] sm:$0xff] %v782_v22  ;;  %847 = vst [vmem:[%s1374_s14 + $0xc0] sm:$0xff] %v698_v21  ;;  %v700_v25 = vadd.f32 %v699_v23, %v1369_v20 }
 0x1d1   : > { %v703_v26 = vpop.f32.mrf.mxu1 }
 0x1d2   : > { %vm752_vm13 = vcmp.gt.f32.partialorder %v700_v25, %v1372_v24  ;;  %v704_v27 = vadd.f32 %v703_v26, %v1367_v19 }
 0x1d3   : > { %v784_v29 = vsel %vm752_vm13, 1.0, %v1144_v28  ;;  %v705_v30 = vpop.f32.mrf.mxu1 }
 0x1d4   : > { %848 = vst [vmem:[%s1374_s14 + $0xc8] sm:$0xff] %v784_v29  ;;  %849 = vst [vmem:[%s1374_s14 + $0xd0] sm:$0xff] %v704_v27  ;;  %v706_v31 = vadd.f32 %v705_v30, %v1369_v20 }
 0x1d5   : > { %v709_v32 = vpop.f32.mrf.mxu1 }
 0x1d6   : > { %vm754_vm14 = vcmp.gt.f32.partialorder %v706_v31, %v1372_v24  ;;  %v710_v33 = vadd.f32 %v709_v32, %v1367_v19 }
 0x1d7   : > { %v786_v34 = vsel %vm754_vm14, 1.0, %v1144_v28  ;;  %v711_v35 = vpop.f32.mrf.mxu1 }
 0x1d8   : > { %850 = vst [vmem:[%s1374_s14 + $0xd8] sm:$0xff] %v786_v34  ;;  %851 = vst [vmem:[%s1374_s14 + $0xe0] sm:$0xff] %v710_v33  ;;  %v712_v36 = vadd.f32 %v711_v35, %v1369_v20 }
 0x1d9   : > { %v715_v37 = vpop.f32.mrf.mxu1 }
 0x1da   : > { %vm756_vm15 = vcmp.gt.f32.partialorder %v712_v36, %v1372_v24  ;;  %v716_v38 = vadd.f32 %v715_v37, %v1367_v19 }
 0x1db   : > { %v788_v39 = vsel %vm756_vm15, 1.0, %v1144_v28  ;;  %v717_v40 = vpop.f32.mrf.mxu1 }
 0x1dc   : > { %852 = vst [vmem:[%s1374_s14 + $0xe8] sm:$0xff] %v788_v39  ;;  %853 = vst [vmem:[%s1374_s14 + $0xf0] sm:$0xff] %v716_v38  ;;  %v718_v41 = vadd.f32 %v717_v40, %v1369_v20 }
 0x1de   : > { %vm758_vm0 = vcmp.gt.f32.partialorder %v718_v41, %v1372_v24 }
 0x1df   : > { %v790_v19 = vsel %vm758_vm0, 1.0, %v1144_v28 }
 0x1e0   : > { %854 = vst [vmem:[%s1374_s14 + $0xf8] sm:$0xff] %v790_v19 }
 0x1e1   : > { %1095 = shalt.err (!%p1092_p3)
}
 0x1e2   : > { %s1096_s29 = scalar_lea.hbm %s1473_s19, 4096  ;;  %s1100_s11 = scalar_lea.hbm %s1528_s6, 8192 }
 0x1e3   : > { %p1097_p4 = scmp.ne.s32.totalorder %s1473_s19, %s1096_s29  ;;  %p1101_p9 = scmp.lt.s32.totalorder %s1473_s19, %s1528_s6 }
 0x1e4   : > { %p1102_p10 = scmp.lt.s32.totalorder %s1100_s11, %s1096_s29 }
 0x1e5   : > { %p1098_p7 = pnand %p1097_p4, %p1224_p5 }
 0x1e6   : > { %p1103_p11 = por %p1102_p10, %p1101_p9 }
 0x1e7   : > { %p1099_p8 = pneg %p1098_p7 }
 0x1e9   : > { %p1104_p12 = pnand %p1103_p11, %p1099_p8 }
 0x1eb   : > { %1107 = shalt.err (!%p1104_p12)
}
 0x1ec   : > { %s1146_s14 = smov 256   ;;  %s1147_s15 = smov 16  }
 0x1ed   : > { %1040 = dma.vmem_to_hbm [thread:$0]  (%p1224_p5), %s1475_s16, 4096, %s1473_s19, %s1482_s0, %s1146_s14, %s1146_s14, %s1147_s15  }
 0x1ee PF: > { %p1046_p13 = scmp.ge.s32.totalorder %s1142_s26, 2  ;;  %s885_s17 = sand.u32 1, %s1130_s23  }
 0x1ef   : > { %s886_s18 = scalar_lea.sflag [#allocation4], %s885_s17 }
 0x1f0   : > { %p1043_p0 = pnand %p1046_p13, %p1228_p6 }
 0x1f2   : > { %p1044_p1 = pneg %p1043_p0 }
 0x1f4   : > { %1125 = dma.done.wait (%p1044_p1), %s886_s18, 4096  }
 0x1f5   : > { %1127 = vsyncadd (%p1044_p1), %s886_s18, 4294963200  ;;  %p17_p2 = scmp.ge.s32.totalorder %s1211_s28, 4   ;;  %s1531_s23 = smov %s1134_s24 }
 0x1f6   : > { %s1532_s24 = smov %s1138_s25  ;;  %s1533_s25 = smov %s1222_s7 }
 0x1f7   : > { %s1534_s26 = smov %s1211_s28  ;;  %19 = sbr.rel (!%p17_p2) target bundleno = 5 (0x5), region = 79 }
 0x1fc   :  { %891 = vsyncpa [#allocation4], 1 }
 0x1fd   :  { %893 = vsyncpa [#allocation4 + $0x1], 1 }

</bundles_post_ra>
